<compile_context>
chip_gen: v7x
topology: tpu7x:2x2x1
jax: 0.10.0
libtpu: 0.0.40
codegen_flags: <defaults>
</compile_context>

<pallas_src>
import jax
import jax.numpy as jnp
from jax.experimental import pallas as pl
from jax.experimental.pallas import tpu as pltpu

LEAKY_SLOPE = 0.01        # nn.LeakyReLU default
BN_EPS = 1e-5             # nn.BatchNorm1d default
LANE = 128                # TPU lane width
SUBLANE = 8               # TPU sublane count (f32)
DOT_DTYPE = jnp.bfloat16  # matmul input dtype (f32 accumulation); jnp.float32 also valid

_HAS_BUFFERED = hasattr(pl, "Buffered")


def _round_up(x, m):
    return ((x + m - 1) // m) * m


def _itemsize(dt):
    return jax.dtypes.canonicalize_dtype(dt).itemsize


def _leaky_relu(x):
    return jnp.where(x > 0, x, LEAKY_SLOPE * x)


# ---------------------------------------------------------------------------
# Kernel: one grid step = (one task head, one batch tile).  Computes the whole
# head: 3 residual blocks (BN folded, dropout = identity) + final Linear.
# ---------------------------------------------------------------------------
def _heads_kernel(z_ref,
                  w0p_ref,            # fused block-0 weights [W0 | Wproj]  (L, 2H)
                  w1_ref, w2_ref,     # blocks 1/2 (identity residual)      (H, H)
                  wo_ref,             # final task-specific Linear          (H, C)
                  bias_ref,           # fused biases (8, 4H + C) f32
                  out_ref):
    hd = w1_ref.shape[0]              # padded hidden dim (static)

    b0p = bias_ref[0:1, 0:2 * hd]
    b1 = bias_ref[0:1, 2 * hd:3 * hd]
    b2 = bias_ref[0:1, 3 * hd:4 * hd]
    bo = bias_ref[0:1, 4 * hd:]

    xb = z_ref[...]                   # (TB, L_pad) in DOT_DTYPE

    # --- ResidualBlock 0 (latent -> hidden, with projection), fused wide dot ---
    h0p = jnp.dot(xb, w0p_ref[...], preferred_element_type=jnp.float32) + b0p
    x = _leaky_relu(h0p[:, :hd]) + h0p[:, hd:]          # f32

    # --- ResidualBlock 1 (hidden -> hidden) ---
    xb = x.astype(w1_ref.dtype)
    h = jnp.dot(xb, w1_ref[...], preferred_element_type=jnp.float32) + b1
    x = _leaky_relu(h) + x

    # --- ResidualBlock 2 (hidden -> hidden) ---
    xb = x.astype(w2_ref.dtype)
    h = jnp.dot(xb, w2_ref[...], preferred_element_type=jnp.float32) + b2
    x = _leaky_relu(h) + x

    # --- Final Linear (hidden -> padded classes), lane-dense store ---
    xb = x.astype(wo_ref.dtype)
    out_ref[...] = (jnp.dot(xb, wo_ref[...], preferred_element_type=jnp.float32)
                    + bo).astype(out_ref.dtype)


# ---------------------------------------------------------------------------
# Parameter packing: pad to TPU tiles, fuse block-0, fuse biases, stack heads.
# ---------------------------------------------------------------------------
def _pad2(a, rows, cols):
    r, c = a.shape
    return jnp.pad(a, ((0, rows - r), (0, cols - c)))


def pack_head_params(all_params, latent_dim, hidden_dim, task_classes):
    l_pad = _round_up(latent_dim, LANE)
    h_pad = _round_up(hidden_dim, LANE)
    c_pad = _round_up(max(task_classes), LANE)

    w0p, w1s, w2s, wos, biases = [], [], [], [], []
    for p in all_params:
        w0 = _pad2(p["w0"], l_pad, h_pad)
        wp = _pad2(p["wp"], l_pad, h_pad)
        w0p.append(jnp.concatenate([w0, wp], axis=1))
        w1s.append(_pad2(p["w1"], h_pad, h_pad))
        w2s.append(_pad2(p["w2"], h_pad, h_pad))
        wos.append(_pad2(p["wo"], h_pad, c_pad))
        # Fused bias: [b0 | bproj | b1 | b2 | bo], replicated to 8 sublanes.
        bias = jnp.concatenate(
            [_pad2(p["b0"], 1, h_pad), _pad2(p["bp"], 1, h_pad),
             _pad2(p["b1"], 1, h_pad), _pad2(p["b2"], 1, h_pad),
             _pad2(p["bo"], 1, c_pad)], axis=1)
        biases.append(jnp.tile(bias, (SUBLANE, 1)))

    stack = lambda xs, dt: jnp.stack(xs).astype(dt)
    return dict(
        w0p=stack(w0p, DOT_DTYPE), w1=stack(w1s, DOT_DTYPE),
        w2=stack(w2s, DOT_DTYPE), wo=stack(wos, DOT_DTYPE),
        bias=stack(biases, jnp.float32),
        dims=(l_pad, h_pad, c_pad),
    )


# ---------------------------------------------------------------------------
# VMEM budget + adaptive batch-tile / weight-buffer-depth selection.
# ---------------------------------------------------------------------------
def _vmem_budget_bytes():
    try:
        cap = int(pltpu.get_tpu_info().vmem_capacity_bytes)
    except Exception:
        cap = 64 << 20            # conservative (v7x per-TC physical VMEM)
    return int(cap * 0.85)


def _vmem_demand(tb, l_pad, h_pad, c_pad, wbuf, obytes):
    wbytes = _itemsize(DOT_DTYPE)
    w_per_head = (l_pad * 2 * h_pad + 2 * h_pad * h_pad + h_pad * c_pad) * wbytes
    bias_per_head = SUBLANE * (4 * h_pad + c_pad) * 4
    weights = wbuf * (w_per_head + bias_per_head)
    z_buf = 2 * tb * l_pad * wbytes
    o_buf = 2 * tb * c_pad * obytes
    # f32 activation temporaries: h0p (tb,2H), x / h (tb,H) each, + a bf16 copy.
    act = tb * (2 * h_pad + 2 * h_pad) * 4 + tb * h_pad * wbytes
    return weights + z_buf + o_buf + act


def _choose_tiling(b, num_heads, l_pad, h_pad, c_pad, out_dtype, budget):
    """Pick (tb, b_pad, nb, weight_buffer_depth) minimizing padding waste
    subject to the VMEM budget; prefer larger tiles / deeper weight pipelines."""
    obytes = _itemsize(out_dtype)
    margin = 2 << 20
    cands = sorted({512, 256, 128, _round_up(b, SUBLANE)}, reverse=True)
    best = None
    for tb in cands:
        b_pad = _round_up(b, tb)
        nb = b_pad // tb
        if _HAS_BUFFERED:
            want = 3 if (nb == 1 and num_heads >= 3) else 2
            depths = list(range(want, 0, -1))
        else:
            depths = [2]
        for wbuf in depths:
            if _vmem_demand(tb, l_pad, h_pad, c_pad, wbuf, obytes) + margin <= budget:
                key = (b_pad - b, -tb, -wbuf)       # waste, then bigger tile/depth
                if best is None or key < best[1]:
                    best = ((tb, b_pad, nb, wbuf), key)
                break
    if best is None:
        # Nothing fits comfortably: smallest tile, single-buffered weights.
        tb = min(cands)
        b_pad = _round_up(b, tb)
        return tb, b_pad, b_pad // tb, (1 if _HAS_BUFFERED else 2)
    return best[0]


# ---------------------------------------------------------------------------
# Forward: one pallas_call over (heads, batch tiles); slice per-head logits.
# ---------------------------------------------------------------------------
def multi_task_predictor_forward(z, packed, task_classes, out_dtype=jnp.float32):
    # out_dtype=jnp.bfloat16 halves output writeback if downstream tolerates it.
    num_heads = packed["w0p"].shape[0]
    l_pad, h_pad, c_pad = packed["dims"]
    b = z.shape[0]

    budget = _vmem_budget_bytes()
    tb, b_pad, nb, wbuf = _choose_tiling(b, num_heads, l_pad, h_pad, c_pad,
                                         out_dtype, budget)

    z_pad = jnp.pad(z, ((0, b_pad - b), (0, l_pad - z.shape[1]))).astype(DOT_DTYPE)

    # --- choose grid order by total HBM traffic ---
    wbytes = _itemsize(DOT_DTYPE)
    w_total = ((packed["w0p"].size + packed["w1"].size + packed["w2"].size
                + packed["wo"].size) * wbytes + packed["bias"].size * 4)
    z_total = b_pad * l_pad * wbytes
    out_total = num_heads * b_pad * c_pad * _itemsize(out_dtype)
    heads_outer = (nb == 1) or (num_heads * z_total + w_total
                                <= z_total + nb * w_total)

    if heads_outer:
        grid = (num_heads, nb)
        z_map = lambda h, bt: (bt, 0)
        head_map = lambda h, bt: (h, 0, 0)
        out_map = lambda h, bt: (h, bt, 0)
        # Megacore split on the head axis -> disjoint per-TC weight reads.
        dims = ("parallel", "arbitrary") if num_heads >= 2 else ("arbitrary", "parallel")
        traffic = w_total + (num_heads if nb > 1 else 1) * z_total + out_total
    else:
        grid = (nb, num_heads)
        z_map = lambda bt, h: (bt, 0)        # z tile resident across head loop
        head_map = lambda bt, h: (h, 0, 0)
        out_map = lambda bt, h: (h, bt, 0)
        dims = ("parallel", "arbitrary")
        traffic = nb * w_total + z_total + out_total

    wkwargs = {}
    if wbuf != 2 and _HAS_BUFFERED:
        wkwargs = dict(pipeline_mode=pl.Buffered(wbuf))

    bias_total = 4 * h_pad + c_pad
    in_specs = [
        pl.BlockSpec((tb, l_pad), z_map),
        pl.BlockSpec((None, l_pad, 2 * h_pad), head_map, **wkwargs),
        pl.BlockSpec((None, h_pad, h_pad), head_map, **wkwargs),
        pl.BlockSpec((None, h_pad, h_pad), head_map, **wkwargs),
        pl.BlockSpec((None, h_pad, c_pad), head_map, **wkwargs),
        pl.BlockSpec((None, SUBLANE, bias_total), head_map, **wkwargs),
    ]
    out_spec = pl.BlockSpec((None, tb, c_pad), out_map)

    flops = 2 * b_pad * num_heads * (l_pad * 2 * h_pad + 2 * h_pad * h_pad
                                     + h_pad * c_pad)

    out = pl.pallas_call(
        _heads_kernel,
        out_shape=jax.ShapeDtypeStruct((num_heads, b_pad, c_pad), out_dtype),
        grid=grid,
        in_specs=in_specs,
        out_specs=out_spec,
        compiler_params=pltpu.CompilerParams(
            dimension_semantics=dims,
            vmem_limit_bytes=budget),
        cost_estimate=pl.CostEstimate(flops=int(flops), transcendentals=0,
                                      bytes_accessed=int(traffic)),
    )(z_pad, packed["w0p"], packed["w1"], packed["w2"], packed["wo"],
      packed["bias"])

    return [out[i, :b, :nc] for i, nc in enumerate(task_classes)]


# ---------------------------------------------------------------------------
# Parameter construction (deterministic, synthetic) + exact BN(eval) folding.
# ---------------------------------------------------------------------------
def _init_linear(key, in_dim, out_dim, scale=0.1):
    kw, kb = jax.random.split(key)
    w = jax.random.normal(kw, (in_dim, out_dim), jnp.float32) * scale
    b = jax.random.normal(kb, (1, out_dim), jnp.float32) * scale
    return w, b


def _init_bn(key, dim):
    kg, kb, km, kv = jax.random.split(key, 4)
    gamma = 1.0 + 0.1 * jax.random.normal(kg, (dim,), jnp.float32)
    beta = 0.1 * jax.random.normal(kb, (dim,), jnp.float32)
    mean = 0.1 * jax.random.normal(km, (dim,), jnp.float32)
    var = jnp.abs(1.0 + 0.1 * jax.random.normal(kv, (dim,), jnp.float32))
    return gamma, beta, mean, var


def _fold_bn(w, b, gamma, beta, mean, var):
    # BN(eval)(x@W + b) == x @ (W*s) + (b*s + shift),  s = gamma/sqrt(var+eps)
    s = gamma / jnp.sqrt(var + BN_EPS)
    shift = beta - mean * s
    return w * s[None, :], b * s[None, :] + shift[None, :]


def make_head_params(key, latent_dim, hidden_dim, num_classes):
    keys = jax.random.split(key, 8)
    w0, b0 = _init_linear(keys[0], latent_dim, hidden_dim)
    w0, b0 = _fold_bn(w0, b0, *_init_bn(keys[1], hidden_dim))
    wp, bp = _init_linear(keys[2], latent_dim, hidden_dim)     # projection: no BN
    w1, b1 = _init_linear(keys[3], hidden_dim, hidden_dim)
    w1, b1 = _fold_bn(w1, b1, *_init_bn(keys[4], hidden_dim))
    w2, b2 = _init_linear(keys[5], hidden_dim, hidden_dim)
    w2, b2 = _fold_bn(w2, b2, *_init_bn(keys[6], hidden_dim))
    wo, bo = _init_linear(keys[7], hidden_dim, num_classes)
    return dict(w0=w0, b0=b0, wp=wp, bp=bp, w1=w1, b1=b1, w2=w2, b2=b2, wo=wo, bo=bo)


# ---------------------------------------------------------------------------
# Pure-JAX references.
# ---------------------------------------------------------------------------
def _ref_head_packed(z_pad, packed, h):
    """Same padded / same-dtype math as the kernel (tight tolerance check)."""
    _, h_pad, _ = packed["dims"]
    bias = packed["bias"][h][0:1]
    b0p = bias[:, :2 * h_pad]
    b1 = bias[:, 2 * h_pad:3 * h_pad]
    b2 = bias[:, 3 * h_pad:4 * h_pad]
    bo = bias[:, 4 * h_pad:]
    h0p = (jnp.dot(z_pad, packed["w0p"][h], preferred_element_type=jnp.float32)
           + b0p)
    x = _leaky_relu(h0p[:, :h_pad]) + h0p[:, h_pad:]
    xb = x.astype(DOT_DTYPE)
    x = _leaky_relu(jnp.dot(xb, packed["w1"][h], preferred_element_type=jnp.float32)
                    + b1) + x
    xb = x.astype(DOT_DTYPE)
    x = _leaky_relu(jnp.dot(xb, packed["w2"][h], preferred_element_type=jnp.float32)
                    + b2) + x
    xb = x.astype(DOT_DTYPE)
    return (jnp.dot(xb, packed["wo"][h], preferred_element_type=jnp.float32)
            + bo)


def _ref_head_f32(z, p):
    """Unpadded fp32 reference (semantic check, loose tolerance for bf16)."""
    x = z
    res = x @ p["wp"] + p["bp"]
    x = _leaky_relu(x @ p["w0"] + p["b0"]) + res
    x = _leaky_relu(x @ p["w1"] + p["b1"]) + x
    x = _leaky_relu(x @ p["w2"] + p["b2"]) + x
    return x @ p["wo"] + p["bo"]


if __name__ == "__main__":
    # Small shapes consistent with forward(z): z is (batch, latent_dim)
    batch = 4
    latent_dim = 16
    hidden_dim = 32
    task_classes = [2, 3]

    key = jax.random.PRNGKey(0)
    kz, kp = jax.random.split(key)
    z = jax.random.normal(kz, (batch, latent_dim), jnp.float32)

    head_keys = jax.random.split(kp, len(task_classes))
    all_params = [make_head_params(hk, latent_dim, hidden_dim, nc)
                  for hk, nc in zip(head_keys, task_classes)]
    packed = pack_head_params(all_params, latent_dim, hidden_dim, task_classes)

    outputs = multi_task_predictor_forward(z, packed, task_classes)
    outputs = [jax.block_until_ready(o) for o in outputs]

    # --- verification ---
    l_pad = packed["dims"][0]
    z_pad = jnp.pad(z, ((0, _round_up(batch, SUBLANE) - batch),
                        (0, l_pad - latent_dim))).astype(DOT_DTYPE)
    for i, (o, p, nc) in enumerate(zip(outputs, all_params, task_classes)):
        assert o.shape == (batch, nc)
        # exact-math (same dtype/padding) reference
        ref_packed = _ref_head_packed(z_pad, packed, i)[:batch, :nc]
        assert jnp.allclose(o, ref_packed, atol=1e-3, rtol=1e-3), \
            "mismatch vs packed reference"
        # fp32 semantic reference (loose tolerance covers bf16 matmul inputs)
        ref_f32 = _ref_head_f32(z, p)
        assert jnp.allclose(o, ref_f32, atol=5e-2, rtol=5e-2), \
            "mismatch vs fp32 reference"

    print("KERNEL_OK")
</pallas_src>

<mosaic_0001>
module attributes {stable_mosaic.version = 11 : i64} {
  func.func @_heads_kernel(%arg0: i32, %arg1: i32, %arg2: memref<8x128xbf16, #tpu.memory_space<vmem>>, %arg3: memref<1x128x256xbf16, #tpu.memory_space<vmem>>, %arg4: memref<1x128x128xbf16, #tpu.memory_space<vmem>>, %arg5: memref<1x128x128xbf16, #tpu.memory_space<vmem>>, %arg6: memref<1x128x128xbf16, #tpu.memory_space<vmem>>, %arg7: memref<1x8x640xf32, #tpu.memory_space<vmem>>, %arg8: memref<1x8x128xf32, #tpu.memory_space<vmem>>) attributes {dimension_semantics = [#tpu.dimension_semantics<parallel>, #tpu.dimension_semantics<arbitrary>], iteration_bounds = array<i64: 2, 1>, scalar_prefetch = 0 : i64, scratch_operands = 0 : i64, tpu.core_type = #tpu.core_type<tc>, window_params = [{transform_indices = @transform_0, window_bounds = array<i64: 8, 128>}, {transform_indices = @transform_1, window_bounds = array<i64: 1, 128, 256>}, {transform_indices = @transform_2, window_bounds = array<i64: 1, 128, 128>}, {transform_indices = @transform_3, window_bounds = array<i64: 1, 128, 128>}, {transform_indices = @transform_4, window_bounds = array<i64: 1, 128, 128>}, {transform_indices = @transform_5, window_bounds = array<i64: 1, 8, 640>}, {transform_indices = @transform_6, window_bounds = array<i64: 1, 8, 128>}]} {
    %c0 = arith.constant 0 : index
    %c0_0 = arith.constant 0 : index
    %c0_1 = arith.constant 0 : index
    %0 = vector.load %arg7[%c0, %c0_0, %c0_1] : memref<1x8x640xf32, #tpu.memory_space<vmem>>, vector<1x1x256xf32>
    %1 = vector.shape_cast %0 : vector<1x1x256xf32> to vector<1x256xf32>
    %c0_2 = arith.constant 0 : index
    %c0_3 = arith.constant 0 : index
    %c256 = arith.constant 256 : index
    %2 = vector.load %arg7[%c0_2, %c0_3, %c256] : memref<1x8x640xf32, #tpu.memory_space<vmem>>, vector<1x1x128xf32>
    %3 = vector.shape_cast %2 : vector<1x1x128xf32> to vector<1x128xf32>
    %c0_4 = arith.constant 0 : index
    %c0_5 = arith.constant 0 : index
    %c384 = arith.constant 384 : index
    %4 = vector.load %arg7[%c0_4, %c0_5, %c384] : memref<1x8x640xf32, #tpu.memory_space<vmem>>, vector<1x1x128xf32>
    %5 = vector.shape_cast %4 : vector<1x1x128xf32> to vector<1x128xf32>
    %c0_6 = arith.constant 0 : index
    %c0_7 = arith.constant 0 : index
    %c512 = arith.constant 512 : index
    %6 = vector.load %arg7[%c0_6, %c0_7, %c512] : memref<1x8x640xf32, #tpu.memory_space<vmem>>, vector<1x1x128xf32>
    %7 = vector.shape_cast %6 : vector<1x1x128xf32> to vector<1x128xf32>
    %c0_8 = arith.constant 0 : index
    %c0_9 = arith.constant 0 : index
    %8 = vector.load %arg2[%c0_8, %c0_9] : memref<8x128xbf16, #tpu.memory_space<vmem>>, vector<8x128xbf16>
    %c0_10 = arith.constant 0 : index
    %c0_11 = arith.constant 0 : index
    %c0_12 = arith.constant 0 : index
    %9 = vector.load %arg3[%c0_10, %c0_11, %c0_12] : memref<1x128x256xbf16, #tpu.memory_space<vmem>>, vector<1x128x256xbf16>
    %10 = vector.shape_cast %9 : vector<1x128x256xbf16> to vector<128x256xbf16>
    %cst = arith.constant dense<0.000000e+00> : vector<8x256xf32>
    %11 = tpu.matmul %8, %10, %cst {dimension_numbers = #tpu.dot_dimension_numbers<[1], [0], [0], [1], [0, 0, 1, 1], [], []>} : vector<8x128xbf16>, vector<128x256xbf16>, vector<8x256xf32> -> vector<8x256xf32>
    %12 = vector.broadcast %1 : vector<1x256xf32> to vector<8x256xf32>
    %13 = arith.addf %11, %12 : vector<8x256xf32>
    %14 = vector.extract_strided_slice %13 {offsets = [0, 0], sizes = [8, 128], strides = [1, 1]} : vector<8x256xf32> to vector<8x128xf32>
    %cst_13 = arith.constant 0.000000e+00 : f32
    %15 = vector.broadcast %cst_13 : f32 to vector<8x128xf32>
    %16 = arith.cmpf ogt, %14, %15 : vector<8x128xf32>
    %cst_14 = arith.constant 0.00999999977 : f32
    %17 = vector.broadcast %cst_14 : f32 to vector<8x128xf32>
    %18 = arith.mulf %17, %14 : vector<8x128xf32>
    %19 = arith.select %16, %14, %18 : vector<8x128xi1>, vector<8x128xf32>
    %20 = vector.extract_strided_slice %13 {offsets = [0, 128], sizes = [8, 128], strides = [1, 1]} : vector<8x256xf32> to vector<8x128xf32>
    %21 = arith.addf %19, %20 : vector<8x128xf32>
    %22 = arith.truncf %21 : vector<8x128xf32> to vector<8x128xbf16>
    %c0_15 = arith.constant 0 : index
    %c0_16 = arith.constant 0 : index
    %c0_17 = arith.constant 0 : index
    %23 = vector.load %arg4[%c0_15, %c0_16, %c0_17] : memref<1x128x128xbf16, #tpu.memory_space<vmem>>, vector<1x128x128xbf16>
    %24 = vector.shape_cast %23 : vector<1x128x128xbf16> to vector<128x128xbf16>
    %cst_18 = arith.constant dense<0.000000e+00> : vector<8x128xf32>
    %25 = tpu.matmul %22, %24, %cst_18 {dimension_numbers = #tpu.dot_dimension_numbers<[1], [0], [0], [1], [0, 0, 1, 1], [], []>} : vector<8x128xbf16>, vector<128x128xbf16>, vector<8x128xf32> -> vector<8x128xf32>
    %26 = vector.broadcast %3 : vector<1x128xf32> to vector<8x128xf32>
    %27 = arith.addf %25, %26 : vector<8x128xf32>
    %cst_19 = arith.constant 0.000000e+00 : f32
    %28 = vector.broadcast %cst_19 : f32 to vector<8x128xf32>
    %29 = arith.cmpf ogt, %27, %28 : vector<8x128xf32>
    %cst_20 = arith.constant 0.00999999977 : f32
    %30 = vector.broadcast %cst_20 : f32 to vector<8x128xf32>
    %31 = arith.mulf %30, %27 : vector<8x128xf32>
    %32 = arith.select %29, %27, %31 : vector<8x128xi1>, vector<8x128xf32>
    %33 = arith.addf %32, %21 : vector<8x128xf32>
    %34 = arith.truncf %33 : vector<8x128xf32> to vector<8x128xbf16>
    %c0_21 = arith.constant 0 : index
    %c0_22 = arith.constant 0 : index
    %c0_23 = arith.constant 0 : index
    %35 = vector.load %arg5[%c0_21, %c0_22, %c0_23] : memref<1x128x128xbf16, #tpu.memory_space<vmem>>, vector<1x128x128xbf16>
    %36 = vector.shape_cast %35 : vector<1x128x128xbf16> to vector<128x128xbf16>
    %cst_24 = arith.constant dense<0.000000e+00> : vector<8x128xf32>
    %37 = tpu.matmul %34, %36, %cst_24 {dimension_numbers = #tpu.dot_dimension_numbers<[1], [0], [0], [1], [0, 0, 1, 1], [], []>} : vector<8x128xbf16>, vector<128x128xbf16>, vector<8x128xf32> -> vector<8x128xf32>
    %38 = vector.broadcast %5 : vector<1x128xf32> to vector<8x128xf32>
    %39 = arith.addf %37, %38 : vector<8x128xf32>
    %cst_25 = arith.constant 0.000000e+00 : f32
    %40 = vector.broadcast %cst_25 : f32 to vector<8x128xf32>
    %41 = arith.cmpf ogt, %39, %40 : vector<8x128xf32>
    %cst_26 = arith.constant 0.00999999977 : f32
    %42 = vector.broadcast %cst_26 : f32 to vector<8x128xf32>
    %43 = arith.mulf %42, %39 : vector<8x128xf32>
    %44 = arith.select %41, %39, %43 : vector<8x128xi1>, vector<8x128xf32>
    %45 = arith.addf %44, %33 : vector<8x128xf32>
    %46 = arith.truncf %45 : vector<8x128xf32> to vector<8x128xbf16>
    %c0_27 = arith.constant 0 : index
    %c0_28 = arith.constant 0 : index
    %c0_29 = arith.constant 0 : index
    %47 = vector.load %arg6[%c0_27, %c0_28, %c0_29] : memref<1x128x128xbf16, #tpu.memory_space<vmem>>, vector<1x128x128xbf16>
    %48 = vector.shape_cast %47 : vector<1x128x128xbf16> to vector<128x128xbf16>
    %cst_30 = arith.constant dense<0.000000e+00> : vector<8x128xf32>
    %49 = tpu.matmul %46, %48, %cst_30 {dimension_numbers = #tpu.dot_dimension_numbers<[1], [0], [0], [1], [0, 0, 1, 1], [], []>} : vector<8x128xbf16>, vector<128x128xbf16>, vector<8x128xf32> -> vector<8x128xf32>
    %50 = vector.broadcast %7 : vector<1x128xf32> to vector<8x128xf32>
    %51 = arith.addf %49, %50 : vector<8x128xf32>
    %c0_31 = arith.constant 0 : index
    %c0_32 = arith.constant 0 : index
    %c0_33 = arith.constant 0 : index
    %52 = vector.load %arg8[%c0_31, %c0_32, %c0_33] : memref<1x8x128xf32, #tpu.memory_space<vmem>>, vector<1x8x128xf32>
    %53 = vector.shape_cast %52 : vector<1x8x128xf32> to vector<8x128xf32>
    %54 = vector.shape_cast %51 : vector<8x128xf32> to vector<1x8x128xf32>
    tpu.vector_store %arg8[%c0_31, %c0_32, %c0_33], %54 {strides = array<i32>} : memref<1x8x128xf32, #tpu.memory_space<vmem>>, vector<1x8x128xf32>,
    return
  }
  func.func @transform_0(%arg0: i32, %arg1: i32) -> (i32, i32) {
    %c0_i32 = arith.constant 0 : i32
    %c0_i32_0 = arith.constant 0 : i32
    return %arg1, %c0_i32 : i32, i32
  }
  func.func @transform_1(%arg0: i32, %arg1: i32) -> (i32, i32, i32) {
    %c0_i32 = arith.constant 0 : i32
    %c0_i32_0 = arith.constant 0 : i32
    %c0_i32_1 = arith.constant 0 : i32
    return %arg0, %c0_i32, %c0_i32_0 : i32, i32, i32
  }
  func.func @transform_2(%arg0: i32, %arg1: i32) -> (i32, i32, i32) {
    %c0_i32 = arith.constant 0 : i32
    %c0_i32_0 = arith.constant 0 : i32
    %c0_i32_1 = arith.constant 0 : i32
    return %arg0, %c0_i32, %c0_i32_0 : i32, i32, i32
  }
  func.func @transform_3(%arg0: i32, %arg1: i32) -> (i32, i32, i32) {
    %c0_i32 = arith.constant 0 : i32
    %c0_i32_0 = arith.constant 0 : i32
    %c0_i32_1 = arith.constant 0 : i32
    return %arg0, %c0_i32, %c0_i32_0 : i32, i32, i32
  }
  func.func @transform_4(%arg0: i32, %arg1: i32) -> (i32, i32, i32) {
    %c0_i32 = arith.constant 0 : i32
    %c0_i32_0 = arith.constant 0 : i32
    %c0_i32_1 = arith.constant 0 : i32
    return %arg0, %c0_i32, %c0_i32_0 : i32, i32, i32
  }
  func.func @transform_5(%arg0: i32, %arg1: i32) -> (i32, i32, i32) {
    %c0_i32 = arith.constant 0 : i32
    %c0_i32_0 = arith.constant 0 : i32
    %c0_i32_1 = arith.constant 0 : i32
    return %arg0, %c0_i32, %c0_i32_0 : i32, i32, i32
  }
  func.func @transform_6(%arg0: i32, %arg1: i32) -> (i32, i32, i32) {
    %c0_i32 = arith.constant 0 : i32
    %c0_i32_0 = arith.constant 0 : i32
    return %arg0, %arg1, %c0_i32 : i32, i32, i32
  }
}

</mosaic_0001>

<bundles_post_ra>
// kernel: tpu_custom_call.1
= control target key start
LH: loop header
LB: loop body
LE: loop exit
PB: predicated region body
PF: predicated region fallthrough
CT: control target
= control target key end

     0   :  { %s2225_s0 = inlined_call_operand.hbm [shape: bf16[8,128], index: 0, kind: input, shape index: {}]   ;;  %s2226_s1 = inlined_call_operand.hbm [shape: bf16[2,128,256], index: 1, kind: input, shape index: {}]   ;;  %s2227_s2 = inlined_call_operand.hbm [shape: bf16[2,128,128], index: 2, kind: input, shape index: {}]   ;;  %s2228_s3 = inlined_call_operand.hbm [shape: bf16[2,128,128], index: 3, kind: input, shape index: {}]   ;;  %s2229_s4 = inlined_call_operand.hbm [shape: bf16[2,128,128], index: 4, kind: input, shape index: {}]   ;;  %s2230_s5 = inlined_call_operand.hbm [shape: f32[2,8,640], index: 5, kind: input, shape index: {}]   ;;  %s2231_s6 = inlined_call_operand.hbm [shape: f32[2,8,128], index: 6, kind: output, shape index: {}]  }
   0x1   :  { %2255 = sst [smem:[#allocation26_spill]] %s2226_s1 }
   0x2   :  { %2256 = sst [smem:[#allocation27_spill]] %s2227_s2 }
   0x3   :  { %2257 = sst [smem:[#allocation28_spill]] %s2228_s3 }
   0x4   :  { %2258 = sst [smem:[#allocation29_spill]] %s2231_s6 }
   0x5   :  { %11 = vsyncpa [#allocation3], 0 }
   0x6   :  { %12 = vsyncpa [#allocation6], 0 }
   0x7   :  { %14 = vsyncpa [#allocation6 + $0x1], 0 }
   0x8   :  { %15 = vsyncpa [#allocation9], 0 }
   0x9   :  { %17 = vsyncpa [#allocation9 + $0x1], 0 }
   0xa   :  { %18 = vsyncpa [#allocation12], 0 }
   0xb   :  { %20 = vsyncpa [#allocation12 + $0x1], 0 }
   0xc   :  { %21 = vsyncpa [#allocation4], 0 }
   0xd   :  { %23 = vsyncpa [#allocation4 + $0x1], 0  ;;  %s1766_s21 = smov 0   ;;  %s1768_s22 = smov 0  }
   0xe   :  { %s1770_s23 = smov 0   ;;  %s1772_s24 = smov 0  }
   0xf   :  { %s1774_s25 = smov 0   ;;  %s1776_s26 = smov 0  }
  0x10 LB: > { %2259 = sst [smem:[#allocation19_spill]] %s1695_s21  ;;  %s41_s27 = sadd.s32 1, %s1711_s25  ;;  %s1715_s26 = sphi %s1776_s26, %s29_s26   ;;  %s1711_s25 = sphi %s1774_s25, %s2301_s25   ;;  %s1707_s24 = sphi %s1772_s24, %s2300_s24   ;;  %s1703_s23 = sphi %s1770_s23, %s2296_s23   ;;  %s1699_s22 = sphi %s1768_s22, %s2299_s22   ;;  %s1695_s21 = sphi %s1766_s21, %s2298_s21  }
  0x11   : > { %2260 = sst [smem:[#allocation20_spill]] %s1703_s23  ;;  %s74_s28 = sadd.s32 1, %s1703_s23 }
  0x12   : > { %2261 = sst [smem:[#allocation21_spill]] %s1715_s26  ;;  %p43_p0 = scmp.ge.s32.totalorder %s41_s27, 2 }
  0x13   : > { %p2232_p1 = scmp.ne.s32.totalorder %s1703_s23, %s1699_s22  ;;  %p82_p2 = scmp.eq.s32.totalorder %s1715_s26, 0 }
  0x14   : > { %s2303_s27 = smov (%p43_p0, %s41_s27), 0  ;;  %p1336_p5 = scmp.lt.s32.totalorder %s1715_s26, 2 }
  0x15   : > { %2262 = sst [smem:[#allocation22_spill]] %s2303_s27  ;;  %p83_p4 = por %p82_p2, %p2232_p1 }
  0x16   : > { %s71_s29 = ssub.s32 %s1711_s25, %s2303_s27  ;;  %s256_s30 = sand.u32 1, %s1715_s26  }
  0x17   : > { %p72_p6 = scmp.eq.s32.totalorder %s71_s29, 0  ;;  %s1812_s7 = sand.u32 1, %s1703_s23  }
  0x18   : > { %s1201_s8 = sshll.u32 %s1711_s25, 11  ;;  %s1137_s10 = sshll.u32 %s1812_s7, 7 }
  0x19   : > { %s1816_s9 = scalar_select %p72_p6, %s1703_s23, %s74_s28  }
  0x1a   : > { %s2264_s1 = sld [smem:[#allocation26_spill]]  ;;  %p1824_p7 = pnand %p1336_p5, %p83_p4 }
  0x1b   : > { %2263 = sst [smem:[#allocation23_spill]] %s1816_s9  ;;  %s260_s15 = scalar_lea.vmem [#allocation5], %s1137_s10 }
  0x1c   : > { %s2265_s14 = scalar_select %p1824_p7, 1, 0 }
  0x1d   : > { %s267_s16 = sshll.u32 %s260_s15, 4  ;;  %s1831_s17 = sshll.u32 %s1812_s7, 6  ;;  %s1828_s16 = int_to_ptr.vmem [resolvable:$true] %s267_s16 }
  0x1e   : > { %s1835_s18 = scalar_lea.sflag [#allocation6], %s256_s30  ;;  %p1841_p9 = pneg %p1824_p7 }
  0x20   : > { %s1822_s13 = scalar_lea.hbm %s2264_s1, %s1201_s8  ;;  %s1448_s8 = scalar_lea.hbm %s2264_s1, 4096 }
  0x21   : > { %s1443_s19 = scalar_lea.hbm %s1822_s13, 2048  ;;  %p1449_p12 = scmp.lt.u32.totalorder %s1822_s13, %s2264_s1 }
  0x22   : > { %p1444_p8 = scmp.ne.s32.totalorder %s1822_s13, %s1443_s19  ;;  %p1450_p13 = scmp.lt.u32.totalorder %s1448_s8, %s1443_s19 }
  0x23   : > { %s2266_s20 = scalar_select %p1841_p9, 1, 0 }
  0x24   : > { %p1446_p10 = pnand %p1841_p9, %p1444_p8  ;;  %p1451_p0 = por %p1450_p13, %p1449_p12 }
  0x25   : > { %p1452_p2 = scmp.lt.u32.totalorder %s1443_s19, %s1822_s13 }
  0x26   : > { %p1447_p11 = pneg %p1446_p10 }
  0x27   : > { %p1453_p4 = por %p1452_p2, %p1451_p0 }
  0x29   : > { %p1454_p5 = pnand %p1453_p4, %p1447_p11 }
  0x2b   : > { %1457 = shalt.err (!%p1454_p5)
}
  0x2c   : > { %s1458_s12 = scalar_lea.vmem %s1828_s16, 2048  ;;  %s1717_s15 = smov [#allocation5]  }
  0x2d   : > { %p1459_p6 = scmp.ne.s32.totalorder %s1828_s16, %s1458_s12  ;;  %s1463_s28 = sshll.u32 %s1717_s15, 4  ;;  %s1464_s28 = int_to_ptr.vmem [resolvable:$false] %s1463_s28 }
  0x2e   : > { %s1465_s29 = scalar_lea.vmem %s1464_s28, 4096  ;;  %p1466_p3 = scmp.lt.s32.totalorder %s1828_s16, %s1464_s28 }
  0x2f   : > { %p1461_p8 = pnand %p1459_p6, %p1841_p9  ;;  %p1467_p1 = scmp.lt.s32.totalorder %s1465_s29, %s1458_s12 }
  0x31   : > { %p1462_p10 = pneg %p1461_p8  ;;  %p1468_p12 = por %p1467_p1, %p1466_p3 }
  0x33   : > { %p1469_p13 = pnand %p1468_p12, %p1462_p10 }
  0x35   : > { %1472 = shalt.err (!%p1469_p13)
}
  0x36   : > { %s1718_s19 = smov 128   ;;  %s1719_s8 = smov 8  }
  0x37   : > { %1318 = dma.hbm_to_vmem [thread:$0]  (!%p1824_p7), %s1822_s13, 2048, %s1828_s16, %s1835_s18, %s1718_s19, %s1718_s19, %s1719_s8  }
  0x38   : > { %s1866_s10 = sshll.u32 %s1711_s25, 10  ;;  %s2267_s3 = sld [smem:[#allocation28_spill]] }
  0x39   : > { %s302_s28 = scalar_lea.vmem [#allocation8], %s1831_s17  ;;  %s1879_s1 = scalar_lea.sflag [#allocation9], %s256_s30 }
  0x3a   : > { %s309_s29 = sshll.u32 %s302_s28, 4  ;;  %s1875_s29 = int_to_ptr.vmem [resolvable:$true] %s309_s29 }
  0x3e   : > { %s1872_s15 = scalar_lea.hbm %s2267_s3, %s1866_s10  ;;  %s1478_s8 = scalar_lea.hbm %s2267_s3, 2048 }
  0x3f   : > { %s1473_s13 = scalar_lea.hbm %s1872_s15, 1024  ;;  %p1479_p0 = scmp.lt.u32.totalorder %s1872_s15, %s2267_s3 }
  0x40   : > { %p1474_p1 = scmp.ne.s32.totalorder %s1872_s15, %s1473_s13  ;;  %p1480_p2 = scmp.lt.u32.totalorder %s1478_s8, %s1473_s13 }
  0x41   : > { %p1482_p5 = scmp.lt.u32.totalorder %s1473_s13, %s1872_s15 }
  0x42   : > { %p1476_p3 = pnand %p1474_p1, %p1841_p9  ;;  %p1481_p4 = por %p1480_p2, %p1479_p0 }
  0x44   : > { %p1477_p11 = pneg %p1476_p3  ;;  %p1483_p6 = por %p1482_p5, %p1481_p4 }
  0x46   : > { %p1484_p8 = pnand %p1483_p6, %p1477_p11 }
  0x48   : > { %1487 = shalt.err (!%p1484_p8)
}
  0x49   : > { %s1488_s30 = scalar_lea.vmem %s1875_s29, 1024  ;;  %s1720_s28 = smov [#allocation8]  }
  0x4a   : > { %p1489_p10 = scmp.ne.s32.totalorder %s1875_s29, %s1488_s30  ;;  %s1493_s16 = sshll.u32 %s1720_s28, 4  ;;  %s1494_s16 = int_to_ptr.vmem [resolvable:$false] %s1493_s16 }
  0x4b   : > { %s1495_s19 = scalar_lea.vmem %s1494_s16, 2048  ;;  %p1496_p1 = scmp.lt.s32.totalorder %s1875_s29, %s1494_s16 }
  0x4c   : > { %p1491_p12 = pnand %p1489_p10, %p1841_p9  ;;  %p1497_p3 = scmp.lt.s32.totalorder %s1495_s19, %s1488_s30 }
  0x4e   : > { %p1492_p13 = pneg %p1491_p12  ;;  %p1498_p0 = por %p1497_p3, %p1496_p1 }
  0x50   : > { %p1499_p2 = pnand %p1498_p0, %p1492_p13 }
  0x52   : > { %1502 = shalt.err (!%p1499_p2)
}
  0x53   : > { %s2233_s13 = smov 64   ;;  %s2235_s8 = smov 4  }
  0x54   : > { %1324 = dma.hbm_to_vmem [thread:$0]  (!%p1824_p7), %s1872_s15, 1024, %s1875_s29, %s1879_s1, %s2233_s13, %s2233_s13, %s2235_s8  }
  0x55   : > { %s1907_s11 = sadd.s32 4294967295, %s1715_s26   ;;  %s1133_s12 = sadd.s32 4294967294, %s1715_s26  }
  0x56   : > { %p87_p11 = scmp.ne.s32.totalorder %s1699_s22, %s1695_s21  ;;  %p2244_p4 = scmp.eq.s32.totalorder %s1907_s11, 0 }
  0x57   : > { %p217_p5 = scmp.eq.s32.totalorder %s1907_s11, 1  ;;  %p223_p6 = scmp.eq.s32.totalorder %s1133_s12, 1 }
  0x58   : > { %p1916_p8 = por %p2244_p4, %p87_p11  ;;  %p1134_p10 = scmp.ge.s32.totalorder %s1715_s26, 1 }
  0x59   : > { %p2269_p12 = scmp.ne.s32.totalorder %s1703_s23, %s1699_s22  ;;  %p1928_p1 = por %p223_p6, %p87_p11 }
  0x5a   : > { %s2268_s30 = scalar_select %p1916_p8, 1, 0 }
  0x5b   : > { %p1924_p13 = por %p217_p5, %p2269_p12  ;;  %p230_p3 = scmp.lt.s32.totalorder %s1715_s26, 3 }
  0x5c   : > { %s2272_s29 = scalar_select %p1928_p1, 1, 0 }
  0x5d   : > { %s2270_s15 = scalar_select %p1924_p13, 1, 0 }
  0x5e   : > { %2273 = sst [smem:[#allocation25_spill]] %s2272_s29  ;;  %p1933_p0 = pnand %p1134_p10, %p230_p3 }
  0x5f   : > { %2271 = sst [smem:[#allocation24_spill]] %s2270_s15  ;;  %s1723_s16 = smov [#allocation2]  }
  0x60   : > { %s2274_s28 = scalar_select %p1933_p0, 1, 0 }
  0x61   : > { %s245_s19 = sshll.u32 %s1723_s16, 4  ;;  %s2275_s2 = sld [smem:[#allocation27_spill]]  ;;  %s1937_s19 = int_to_ptr.vmem [resolvable:$true] %s245_s19 }
  0x62   : > { %p1311_p2 = pneg %p1933_p0  ;;  %s281_s3 = scalar_lea.vmem [#allocation7], %s1831_s17 }
  0x63   : > { %s288_s27 = sshll.u32 %s281_s3, 4  ;;  %s1960_s13 = scalar_lea.hbm %s2229_s4, %s1866_s10  ;;  %s1948_s27 = int_to_ptr.vmem [resolvable:$true] %s288_s27 }
  0x64   : > { %p1952_p11 = pnand %p1311_p2, %p2244_p4 }
  0x66   : > { %s2276_s16 = scalar_select %p1952_p11, 1, 0 }
  0x67   : > { %s1943_s8 = scalar_lea.hbm %s2275_s2, %s1866_s10  ;;  %s1508_s3 = scalar_lea.hbm %s2275_s2, 2048 }
  0x68   : > { %s1503_s12 = scalar_lea.hbm %s1943_s8, 1024  ;;  %p1509_p12 = scmp.lt.u32.totalorder %s1943_s8, %s2275_s2 }
  0x69   : > { %p1504_p5 = scmp.ne.s32.totalorder %s1943_s8, %s1503_s12  ;;  %p1510_p3 = scmp.lt.u32.totalorder %s1508_s3, %s1503_s12 }
  0x6a   : > { %p1512_p4 = scmp.lt.u32.totalorder %s1503_s12, %s1943_s8 }
  0x6b   : > { %p1506_p6 = pnand %p1504_p5, %p1841_p9  ;;  %p1511_p2 = por %p1510_p3, %p1509_p12 }
  0x6d   : > { %p1507_p10 = pneg %p1506_p6  ;;  %p1513_p1 = por %p1512_p4, %p1511_p2 }
  0x6f   : > { %p1514_p13 = pnand %p1513_p1, %p1507_p10 }
  0x71   : > { %1517 = shalt.err (!%p1514_p13)
}
  0x72   : > { %s1518_s23 = scalar_lea.vmem %s1948_s27, 1024  ;;  %s1724_s26 = smov [#allocation7]  }
  0x73   : > { %p1519_p5 = scmp.ne.s32.totalorder %s1948_s27, %s1518_s23  ;;  %s1523_s9 = sshll.u32 %s1724_s26, 4  ;;  %s1524_s9 = int_to_ptr.vmem [resolvable:$false] %s1523_s9 }
  0x74   : > { %s1525_s6 = scalar_lea.vmem %s1524_s9, 2048  ;;  %p1526_p0 = scmp.lt.s32.totalorder %s1948_s27, %s1524_s9 }
  0x75   : > { %p1521_p6 = pnand %p1519_p5, %p1841_p9  ;;  %p1527_p11 = scmp.lt.s32.totalorder %s1525_s6, %s1518_s23 }
  0x77   : > { %p1522_p8 = pneg %p1521_p6  ;;  %p1528_p12 = por %p1527_p11, %p1526_p0 }
  0x79   : > { %p1529_p3 = pnand %p1528_p12, %p1522_p8 }
  0x7b   : > { %1532 = shalt.err (!%p1529_p3)
}
  0x7c   : > { %s2277_s21 = smov 4   ;;  %s2278_s10 = smov 64  }
  0x7d   : > { %1321 = dma.hbm_to_vmem [thread:$0]  (!%p1824_p7), %s1943_s8, 1024, %s1948_s27, %s1835_s18, %s2278_s10, %s2278_s10, %s2277_s21  }
  0x7e   : > { %s323_s29 = scalar_lea.vmem [#allocation10], %s1831_s17  ;;  %s1533_s23 = scalar_lea.hbm %s2225_s0, 64 }
  0x7f   : > { %s330_s12 = sshll.u32 %s323_s29, 4  ;;  %p1534_p4 = scmp.ne.s32.totalorder %s2225_s0, %s1533_s23  ;;  %s2009_s12 = int_to_ptr.vmem [resolvable:$true] %s330_s12 }
  0x80   : > { %p2279_p8 = scmp.ne.s32.totalorder %s2276_s16, 0  ;;  %p1540_p11 = scmp.lt.u32.totalorder %s1533_s23, %s2225_s0 }
  0x82   : > { %p1535_p13 = pneg %p2279_p8 }
  0x84   : > { %p1536_p1 = pnand %p1535_p13, %p1534_p4 }
  0x86   : > { %p1537_p0 = pneg %p1536_p1 }
  0x88   : > { %p1542_p10 = pnand %p1540_p11, %p1537_p0 }
  0x8a   : > { %1545 = shalt.err (!%p1542_p10)
}
  0x8b   : > { %s1546_s27 = scalar_lea.vmem %s1937_s19, 64  ;;  %p1554_p12 = scmp.lt.s32.totalorder %s1937_s19, %s1937_s19 }
  0x8c   : > { %p1547_p2 = scmp.ne.s32.totalorder %s1937_s19, %s1546_s27  ;;  %p1555_p3 = scmp.lt.s32.totalorder %s1546_s27, %s1546_s27 }
  0x8e   : > { %p1549_p5 = pnand %p1547_p2, %p1535_p13  ;;  %p1556_p7 = por %p1555_p3, %p1554_p12 }
  0x90   : > { %p1550_p6 = pneg %p1549_p5 }
  0x92   : > { %p1557_p9 = pnand %p1556_p7, %p1550_p6 }
  0x94   : > { %1560 = shalt.err (!%p1557_p9)
}
  0x95   : > { %1314 = dma.hbm_to_vmem [thread:$0]  (!%p2279_p8), %s2225_s0, 64, %s1937_s19, [#allocation3]  }
  0x96   : > { %s1561_s18 = scalar_lea.hbm %s1960_s13, 1024  ;;  %p2280_p13 = scmp.ne.s32.totalorder %s2266_s20, 0 }
  0x97   : > { %p1562_p4 = scmp.ne.s32.totalorder %s1960_s13, %s1561_s18  ;;  %s1566_s16 = scalar_lea.hbm %s2229_s4, 2048 }
  0x98   : > { %p1567_p9 = scmp.lt.u32.totalorder %s1960_s13, %s2229_s4  ;;  %p1568_p0 = scmp.lt.u32.totalorder %s1566_s16, %s1561_s18 }
  0x99   : > { %p1564_p1 = pnand %p1562_p4, %p2280_p13  ;;  %p1570_p10 = scmp.lt.u32.totalorder %s1561_s18, %s1960_s13 }
  0x9a   : > { %p1569_p11 = por %p1568_p0, %p1567_p9 }
  0x9b   : > { %p1565_p7 = pneg %p1564_p1 }
  0x9c   : > { %p1571_p2 = por %p1570_p10, %p1569_p11 }
  0x9e   : > { %p1572_p8 = pnand %p1571_p2, %p1565_p7 }
  0xa0   : > { %1575 = shalt.err (!%p1572_p8)
}
  0xa1   : > { %s1576_s19 = scalar_lea.vmem %s2009_s12, 1024  ;;  %s1725_s26 = smov [#allocation10]  }
  0xa2   : > { %p1577_p5 = scmp.ne.s32.totalorder %s2009_s12, %s1576_s19  ;;  %s1581_s23 = sshll.u32 %s1725_s26, 4  ;;  %s1582_s23 = int_to_ptr.vmem [resolvable:$false] %s1581_s23 }
  0xa3   : > { %s1583_s9 = scalar_lea.vmem %s1582_s23, 2048  ;;  %p1584_p3 = scmp.lt.s32.totalorder %s2009_s12, %s1582_s23 }
  0xa4   : > { %p1579_p6 = pnand %p1577_p5, %p2280_p13  ;;  %p1585_p4 = scmp.lt.s32.totalorder %s1583_s9, %s1576_s19 }
  0xa6   : > { %p1580_p12 = pneg %p1579_p6  ;;  %p1586_p1 = por %p1585_p4, %p1584_p3 }
  0xa8   : > { %p1587_p9 = pnand %p1586_p1, %p1580_p12 }
  0xaa   : > { %1590 = shalt.err (!%p1587_p9)
}
  0xab   : > { %p2281_p7 = scmp.ne.s32.totalorder %s2265_s14, 0  ;;  %s1292_s6 = smul.u32 40, %s1812_s7 }
  0xac   : > { %s1293_s27 = smul.u32 640, %s1711_s25  ;;  %s341_s16 = scalar_lea.sflag [#allocation12], %s1812_s7 }
  0xad   : > { %1327 = dma.hbm_to_vmem [thread:$0]  (!%p2281_p7), %s1960_s13, 1024, %s2009_s12, %s1879_s1, %s2278_s10, %s2278_s10, %s2277_s21  }
  0xae   : > { %s2041_s18 = scalar_lea.hbm %s2230_s5, %s1293_s27  ;;  %s344_s8 = scalar_lea.vmem [#allocation11], %s1292_s6 }
  0xaf   : > { %s352_s15 = sshll.u32 %s344_s8, 4  ;;  %s1591_s29 = scalar_lea.hbm %s2041_s18, 640  ;;  %s353_s15 = int_to_ptr.vmem [resolvable:$true] %s352_s15 }
  0xb0   : > { %p1592_p0 = scmp.ne.s32.totalorder %s2041_s18, %s1591_s29  ;;  %s1596_s21 = scalar_lea.hbm %s2230_s5, 1280 }
  0xb1   : > { %p1597_p2 = scmp.lt.u32.totalorder %s2041_s18, %s2230_s5  ;;  %p1598_p8 = scmp.lt.u32.totalorder %s1596_s21, %s1591_s29 }
  0xb2   : > { %p1594_p11 = pnand %p1592_p0, %p2280_p13  ;;  %p1600_p6 = scmp.lt.u32.totalorder %s1591_s29, %s2041_s18 }
  0xb3   : > { %p1599_p5 = por %p1598_p8, %p1597_p2 }
  0xb4   : > { %p1595_p10 = pneg %p1594_p11 }
  0xb5   : > { %p1601_p12 = por %p1600_p6, %p1599_p5 }
  0xb7   : > { %p1602_p3 = pnand %p1601_p12, %p1595_p10 }
  0xb9   : > { %1605 = shalt.err (!%p1602_p3)
}
  0xba   : > { %s1606_s7 = scalar_lea.vmem %s353_s15, 640  ;;  %s1726_s3 = smov [#allocation11]  }
  0xbb   : > { %p1607_p4 = scmp.ne.s32.totalorder %s353_s15, %s1606_s7  ;;  %s1611_s19 = sshll.u32 %s1726_s3, 4  ;;  %s1612_s19 = int_to_ptr.vmem [resolvable:$false] %s1611_s19 }
  0xbc   : > { %s1613_s26 = scalar_lea.vmem %s1612_s19, 1280  ;;  %p1614_p0 = scmp.lt.s32.totalorder %s353_s15, %s1612_s19 }
  0xbd   : > { %p1609_p1 = pnand %p1607_p4, %p2280_p13  ;;  %p1615_p11 = scmp.lt.s32.totalorder %s1613_s26, %s1606_s7 }
  0xbf   : > { %p1610_p9 = pneg %p1609_p1  ;;  %p1616_p7 = por %p1615_p11, %p1614_p0 }
  0xc1   : > { %p1617_p2 = pnand %p1616_p7, %p1610_p9 }
  0xc3   : > { %1620 = shalt.err (!%p1617_p2)
}
  0xc4   : > { %p2282_p8 = scmp.ne.s32.totalorder %s2265_s14, 0  ;;  %p2283_p10 = scmp.ne.s32.totalorder %s2274_s28, 0 }
  0xc5   : > { %p2284_p5 = scmp.eq.s32.totalorder (!%p2283_p10), %s1907_s11, 0 }
  0xc6   : > { %1330 = dma.hbm_to_vmem [thread:$0]  (!%p2282_p8), %s2041_s18, 640, %s353_s15, %s341_s16  }
  0xc7   : > { %361 = sbr.rel (%p2283_p10) target bundleno = 1144 (0x478), region = 44 }
  0xce   : > { %1674 = dma.done.wait (%p2284_p5), [#allocation3], 64   ;;  %p2285_p13 = pmov %p2284_p5 }
  0xcf   : > { %s367_s20 = sand.u32 1, %s1907_s11   ;;  %s2069_s23 = sand.u32 1, %s1699_s22  }
  0xd0   : > { %1676 = vsyncadd (%p2285_p13), [#allocation3], 4294967232  ;;  %s1152_s9 = sshll.u32 %s2069_s23, 7  ;;  %s368_s14 = scalar_lea.sflag [#allocation6], %s367_s20 }
  0xd1   : > { %s2072_s6 = scalar_lea.vmem [#allocation5], %s1152_s9  ;;  %p2286_p7 = scmp.ne.s32.totalorder %s2268_s30, 0 }
  0xd3   : > { %1678 = dma.done.wait (%p2286_p7), %s368_s14, 3072  }
  0xd4   : > { %1680 = vsyncadd (%p2286_p7), %s368_s14, 4294964224  ;;  %s1153_s28 = sshll.u32 %s2069_s23, 6  ;;  %s386_s2 = scalar_lea.sflag [#allocation9], %s367_s20 }
  0xd5   : > { %s2079_s27 = scalar_lea.vmem [#allocation7], %s1153_s28  ;;  %s2081_s17 = scalar_lea.vmem [#allocation8], %s1153_s28 }
  0xd6   : > { %1682 = dma.done.wait (%p2286_p7), %s386_s2, 2048  }
  0xd7   : > { %1684 = vsyncadd (%p2286_p7), %s386_s2, 4294965248  ;;  %s1294_s11 = smul.u32 40, %s2069_s23  ;;  %s2088_s18 = scalar_lea.vmem [#allocation10], %s1153_s28 }
  0xd8   : > { %s404_s8 = scalar_lea.sflag [#allocation12], %s2069_s23 }
  0xd9   : > { %s2091_s15 = scalar_lea.vmem [#allocation11], %s1294_s11 }
  0xda   : > { %1686 = dma.done.wait (%p2286_p7), %s404_s8, 640  }
  0xdb   : > { %1688 = vsyncadd (%p2286_p7), %s404_s8, 4294966656  ;;  %v1727_v0 = vmov 0   ;;  %v1728_v1 = vmov 0.0   ;;  %v1395_v2 = vld [vmem:[%s2072_s6 + $0x4] ss:$8 sps:$4 sm:$0xff]   ;;  %v1421_v16 = vld [vmem:[%s2079_s27 + $0x10] sm:$0xff]   ;;  %v479_v33 = vlaneseq }
  0xdc   : > { %601 = vmatprep.mubr.bf16.mxu0 %v1727_v0  ;;  %1232 = vmatprep.subr.bf16.mxu1 %v1728_v1  ;;  %v1397_v3 = vld [vmem:[%s2072_s6] ss:$8 sps:$4 sm:$0xff]   ;;  %v1398_v4 = vld [vmem:[%s2072_s6 + $0x14] ss:$8 sps:$4 sm:$0xff]   ;;  %v1400_v5 = vld [vmem:[%s2072_s6 + $0x10] ss:$8 sps:$4 sm:$0xff]  }
  0xdd   : > { %569 = vmatprep.subr.bf16.mxu0 %v1395_v2  ;;  %v1401_v6 = vld [vmem:[%s2072_s6 + $0x24] ss:$8 sps:$4 sm:$0xff]   ;;  %v1403_v7 = vld [vmem:[%s2072_s6 + $0x20] ss:$8 sps:$4 sm:$0xff]   ;;  %v1404_v8 = vld [vmem:[%s2072_s6 + $0x34] ss:$8 sps:$4 sm:$0xff]  }
  0xde   : > { %570 = vmatpush1.bf16.msra.mxu0 %v1397_v3  ;;  %v1406_v9 = vld [vmem:[%s2072_s6 + $0x30] ss:$8 sps:$4 sm:$0xff]   ;;  %v1419_v10 = vld [vmem:[%s2079_s27] sm:$0xff]   ;;  %v1420_v12 = vld [vmem:[%s2079_s27 + $0x8] sm:$0xff]   ;;  %vm1729_vm0 = vmmov 0   ;;  %v480_v34 = vshrl.u32 %v479_v33, 7 }
  0xdf   : > { %571 = vmatprep.subr.bf16.mxu0 %v1398_v4  ;;  %v1407_v11 = vld [vmem:[%s2072_s6 + $0x44] ss:$8 sps:$4 sm:$0xff]   ;;  %1233 = vmatpush3.bf16.msra.mxu1 %v1419_v10  ;;  %v1409_v13 = vld [vmem:[%s2072_s6 + $0x40] ss:$8 sps:$4 sm:$0xff]   ;;  %v1410_v14 = vld [vmem:[%s2072_s6 + $0x54] ss:$8 sps:$4 sm:$0xff]  }
  0xe0   : > { %1234 = vmatprep.subr.bf16.mxu1 %v1728_v1  ;;  %v1412_v15 = vld [vmem:[%s2072_s6 + $0x50] ss:$8 sps:$4 sm:$0xff]   ;;  %v1413_v17 = vld [vmem:[%s2072_s6 + $0x64] ss:$8 sps:$4 sm:$0xff]   ;;  %v1415_v19 = vld [vmem:[%s2072_s6 + $0x60] ss:$8 sps:$4 sm:$0xff]   ;;  %1248 = vmatprep.mubr.msk.bf16.mxu1 %vm1729_vm0, %v1728_v1 }
  0xe1   : > { %v1422_v18 = vld [vmem:[%s2079_s27 + $0x18] sm:$0xff]   ;;  %v1423_v21 = vld [vmem:[%s2079_s27 + $0x20] sm:$0xff]   ;;  %v1424_v23 = vld [vmem:[%s2079_s27 + $0x28] sm:$0xff]   ;;  %v481_v35 = vsub.s32 0, %v480_v34  ;;  %v485_v37 = vsub.s32 1, %v480_v34  ;;  %s1156_s30 = sshll.u32 %s2069_s23, 3 }
  0xe2   : > { %572 = vmatpush1.bf16.msra.mxu0 %v1400_v5  ;;  %v1416_v20 = vld [vmem:[%s2072_s6 + $0x74] ss:$8 sps:$4 sm:$0xff]   ;;  %v1418_v22 = vld [vmem:[%s2072_s6 + $0x70] ss:$8 sps:$4 sm:$0xff]   ;;  %v1427_v27 = vld [vmem:[%s2081_s17] sm:$0xff]   ;;  %s2287_s16 = sld [smem:[#allocation24_spill]] }
  0xe3   : > { %573 = vmatprep.subr.bf16.mxu0 %v1401_v6  ;;  %1235 = vmatpush3.bf16.msra.mxu1 %v1420_v12  ;;  %v461_v24 = vld [vmem:[#allocation2] sm:$0xf]  ;;  %v1425_v25 = vld [vmem:[%s2079_s27 + $0x30] sm:$0xff]   ;;  %v1428_v28 = vld [vmem:[%s2081_s17 + $0x8] sm:$0xff]   ;;  %s1198_s29 = sshll.u32 %s1707_s24, 7  ;;  %s455_s1 = scalar_lea.vmem [#allocation13], %s1156_s30 }
  0xe4   : > { %1236 = vmatprep.subr.bf16.mxu1 %v1728_v1  ;;  %v1426_v26 = vld [vmem:[%s2079_s27 + $0x38] sm:$0xff]   ;;  %v1429_v29 = vld [vmem:[%s2081_s17 + $0x10] sm:$0xff]   ;;  %v1431_v31 = vld [vmem:[%s2081_s17 + $0x20] sm:$0xff]   ;;  %s953_s13 = sshll.u32 %s455_s1, 4  ;;  %s2288_s12 = sld [smem:[#allocation29_spill]]  ;;  %s2178_s13 = int_to_ptr.vmem [resolvable:$true] %s953_s13 }
  0xe5   : > { %v1430_v30 = vld [vmem:[%s2081_s17 + $0x18] sm:$0xff]   ;;  %v1432_v32 = vld [vmem:[%s2081_s17 + $0x28] sm:$0xff]   ;;  %v1433_v50 = vld [vmem:[%s2081_s17 + $0x30] sm:$0xff]   ;;  %s939_s3 = scalar_lea.sflag [#allocation4], %s2069_s23  ;;  %s1621_s24 = scalar_lea.vmem %s2178_s13, 128 }
  0xe6   : > { %574 = vmatpush1.bf16.msra.mxu0 %v1403_v7  ;;  %v457_v36 = vld [vmem:[%s2091_s15] ss:$8 sm:$0x3]  ;;  %v1434_v51 = vld [vmem:[%s2081_s17 + $0x38] sm:$0xff]   ;;  %p1622_p6 = scmp.ne.s32.totalorder %s2178_s13, %s1621_s24  ;;  %s1730_s19 = smov [#allocation13]  }
  0xe7   : > { %575 = vmatprep.subr.bf16.mxu0 %v1404_v8  ;;  %1237 = vmatpush3.bf16.msra.mxu1 %v1421_v16  ;;  %v482_v38 = vrot.slane %v457_v36, %v481_v35  ;;  %v486_v40 = vrot.slane %v457_v36, %v485_v37  ;;  %v1435_v52 = vld [vmem:[%s2088_s18] sm:$0xff]   ;;  %v1436_v53 = vld [vmem:[%s2088_s18 + $0x8] sm:$0xff]   ;;  %v1437_v54 = vld [vmem:[%s2088_s18 + $0x10] sm:$0xff]   ;;  %s1625_s26 = sshll.u32 %s1730_s19, 4  ;;  %s1626_s26 = int_to_ptr.vmem [resolvable:$false] %s1625_s26 }
  0xe8   : > { %1238 = vmatprep.subr.bf16.mxu1 %v1728_v1  ;;  %v1438_v55 = vld [vmem:[%s2088_s18 + $0x18] sm:$0xff]   ;;  %v1439_v56 = vld [vmem:[%s2088_s18 + $0x20] sm:$0xff]   ;;  %v1440_v57 = vld [vmem:[%s2088_s18 + $0x28] sm:$0xff]   ;;  %p2289_p12 = scmp.ne.s32.totalorder %s2287_s16, 0  ;;  %s1627_s20 = scalar_lea.vmem %s1626_s26, 256 }
  0xe9   : > { %v458_v58 = vld [vmem:[%s2091_s15 + $0x10] ss:$0 sm:$0xff]  ;;  %v459_v7 = vld [vmem:[%s2091_s15 + $0x18] ss:$0 sm:$0xff]  ;;  %p1628_p1 = scmp.lt.s32.totalorder %s2178_s13, %s1626_s26  ;;  %p1629_p9 = scmp.lt.s32.totalorder %s1627_s20, %s1621_s24 }
  0xea   : > { %576 = vmatpush1.bf16.msra.mxu0 %v1406_v9  ;;  %v1441_v5 = vld [vmem:[%s2088_s18 + $0x30] sm:$0xff]   ;;  %v1442_v6 = vld [vmem:[%s2088_s18 + $0x38] sm:$0xff]   ;;  %s2176_s7 = scalar_lea.hbm %s2288_s12, %s1198_s29  ;;  %p1623_p3 = pnand %p1622_p6, %p2289_p12 }
  0xeb   : > { %577 = vmatprep.subr.bf16.mxu0 %v1407_v11  ;;  %1239 = vmatpush3.bf16.msra.mxu1 %v1422_v18  ;;  %p1630_p0 = por %p1629_p9, %p1628_p1 }
  0xec   : > { %1240 = vmatprep.subr.bf16.mxu1 %v1728_v1  ;;  %p1624_p4 = pneg %p1623_p3 }
  0xee   : > { %578 = vmatpush1.bf16.msra.mxu0 %v1409_v13  ;;  %p1631_p11 = pnand %p1630_p0, %p1624_p4 }
  0xef   : > { %579 = vmatprep.subr.bf16.mxu0 %v1410_v14  ;;  %1241 = vmatpush3.bf16.msra.mxu1 %v1423_v21 }
  0xf0   : > { %1242 = vmatprep.subr.bf16.mxu1 %v1728_v1 }
  0xf2   : > { %580 = vmatpush1.bf16.msra.mxu0 %v1412_v15 }
  0xf3   : > { %581 = vmatprep.subr.bf16.mxu0 %v1413_v17  ;;  %1243 = vmatpush3.bf16.msra.mxu1 %v1424_v23 }
  0xf4   : > { %1244 = vmatprep.subr.bf16.mxu1 %v1728_v1 }
  0xf6   : > { %582 = vmatpush1.bf16.msra.mxu0 %v1415_v19 }
  0xf7   : > { %583 = vmatprep.subr.bf16.mxu0 %v1416_v20  ;;  %1245 = vmatpush3.bf16.msra.mxu1 %v1425_v25 }
  0xf8   : > { %1246 = vmatprep.subr.bf16.mxu1 %v1728_v1 }
  0xfa   : > { %584 = vmatpush1.bf16.msra.mxu0 %v1418_v22 }
  0xfb   : > { %1252 = vmatprep.subr.bf16.mxu0 %v1728_v1  ;;  %1247 = vmatpush3.bf16.msra.mxu1 %v1426_v26 }
  0xfc   : > { %1272 = vmatprep.subr.bf16.mxu1 %v1728_v1 }
  0xfd   : > { %602 = vmatmul.mubr.bf16.vlgmr.msra.gmra.mrb[0].mxu0 %v461_v24 }
  0xfe   : > { %1268 = vmatprep.mubr.msk.bf16.mxu0 %vm1729_vm0, %v1728_v1  ;;  %1253 = vmatpush3.bf16.msra.mxu0 %v1427_v27 }
  0xff   : > { %1254 = vmatprep.subr.bf16.mxu0 %v1728_v1 }
 0x102   : > { %1255 = vmatpush3.bf16.msra.mxu0 %v1428_v28 }
 0x103   : > { %1256 = vmatprep.subr.bf16.mxu0 %v1728_v1 }
 0x106   : > { %1257 = vmatpush3.bf16.msra.mxu0 %v1429_v29 }
 0x107   : > { %1258 = vmatprep.subr.bf16.mxu0 %v1728_v1 }
 0x10a   : > { %1259 = vmatpush3.bf16.msra.mxu0 %v1430_v30 }
 0x10b   : > { %1260 = vmatprep.subr.bf16.mxu0 %v1728_v1 }
 0x10e   : > { %1261 = vmatpush3.bf16.msra.mxu0 %v1431_v31 }
 0x10f   : > { %1262 = vmatprep.subr.bf16.mxu0 %v1728_v1 }
 0x112   : > { %1263 = vmatpush3.bf16.msra.mxu0 %v1432_v32 }
 0x113   : > { %1264 = vmatprep.subr.bf16.mxu0 %v1728_v1 }
 0x116   : > { %1265 = vmatpush3.bf16.msra.mxu0 %v1433_v50 }
 0x117   : > { %1266 = vmatprep.subr.bf16.mxu0 %v1728_v1 }
 0x11a   : > { %1267 = vmatpush3.bf16.msra.mxu0 %v1434_v51 }
 0x1d0   : > { %v603_v39 = vpop.f32.mrb[0].mxu0 }
 0x1d1   : > { %v604_v41 = vadd.f32 %v603_v39, %v482_v38  ;;  %v605_v42 = vpop.f32.mrb[1].mxu0 }
 0x1d2   : > { %v607_v43 = vpop.f32.mrb[2].mxu0  ;;  %v606_v46 = vadd.f32 %v605_v42, %v486_v40 }
 0x1d3   : > { %vm610_vm1 = vcmp.gt.f32.partialorder %v604_v41, 0.0  ;;  %v611_v44 = vmul.f32 0.01, %v604_v41  ;;  %v608_v45 = vpop.f32.mrb[3].mxu0 }
 0x1d5   : > { %v612_v47 = vsel %vm610_vm1, %v604_v41, %v611_v44 }
 0x1d6   : > { %v613_v48 = vadd.f32 %v612_v47, %v606_v46 }
 0x1d8   : > { %v614_v49 = vpack.c.bf16 %v613_v48, %v613_v48 }
 0x1da   : > { %1249 = vmatmul.mubr.bf16.vlgmr.msra.gmra.mrb[0].mxu1 %v614_v49 }
 0x1db   : > { %1288 = vmatprep.mubr.msk.bf16.mxu1 %vm1729_vm0, %v1728_v1  ;;  %1273 = vmatpush3.bf16.msra.mxu1 %v1435_v52 }
 0x1dc   : > { %1274 = vmatprep.subr.bf16.mxu1 %v1728_v1 }
 0x1df   : > { %1275 = vmatpush3.bf16.msra.mxu1 %v1436_v53 }
 0x1e0   : > { %1276 = vmatprep.subr.bf16.mxu1 %v1728_v1 }
 0x1e3   : > { %1277 = vmatpush3.bf16.msra.mxu1 %v1437_v54 }
 0x1e4   : > { %1278 = vmatprep.subr.bf16.mxu1 %v1728_v1 }
 0x1e7   : > { %1279 = vmatpush3.bf16.msra.mxu1 %v1438_v55 }
 0x1e8   : > { %1280 = vmatprep.subr.bf16.mxu1 %v1728_v1 }
 0x1eb   : > { %1281 = vmatpush3.bf16.msra.mxu1 %v1439_v56 }
 0x1ec   : > { %1282 = vmatprep.subr.bf16.mxu1 %v1728_v1 }
 0x1ef   : > { %1283 = vmatpush3.bf16.msra.mxu1 %v1440_v57 }
 0x1f0   : > { %1284 = vmatprep.subr.bf16.mxu1 %v1728_v1 }
 0x1f3   : > { %1285 = vmatpush3.bf16.msra.mxu1 %v1441_v5 }
 0x1f4   : > { %1286 = vmatprep.subr.bf16.mxu1 %v1728_v1  ;;  %v460_v1 = vld [vmem:[%s2091_s15 + $0x20] ss:$0 sm:$0xff] }
 0x1f7   : > { %1287 = vmatpush3.bf16.msra.mxu1 %v1442_v6 }
 0x2ad   : > { %v713_v59 = vpop.f32.mrb[0].mxu1 }
 0x2ae   : > { %v714_v60 = vadd.f32 %v713_v59, %v458_v58  ;;  %v1250_v61 = vpop.f32.mrb[1].mxu1 }
 0x2af   : > { %v716_v62 = vpop.f32.mrb[2].mxu1 }
 0x2b0   : > { %vm719_vm2 = vcmp.gt.f32.partialorder %v714_v60, 0.0  ;;  %v720_v63 = vmul.f32 0.01, %v714_v60  ;;  %v1251_v0 = vpop.f32.mrb[3].mxu1 }
 0x2b2   : > { %v721_v2 = vsel %vm719_vm2, %v714_v60, %v720_v63 }
 0x2b3   : > { %v722_v3 = vadd.f32 %v721_v2, %v613_v48 }
 0x2b5   : > { %v723_v4 = vpack.c.bf16 %v722_v3, %v722_v3 }
 0x2b7   : > { %1269 = vmatmul.mubr.bf16.vlgmr.msra.gmra.mrb[4].mxu0 %v723_v4 }
 0x38a   : > { %v822_v8 = vpop.f32.mrb[4].mxu0 }
 0x38b   : > { %v823_v9 = vadd.f32 %v822_v8, %v459_v7  ;;  %v1270_v10 = vpop.f32.mrb[5].mxu0 }
 0x38c   : > { %v825_v11 = vpop.f32.mrb[6].mxu0 }
 0x38d   : > { %vm828_vm3 = vcmp.gt.f32.partialorder %v823_v9, 0.0  ;;  %v829_v12 = vmul.f32 0.01, %v823_v9  ;;  %v1271_v13 = vpop.f32.mrb[7].mxu0 }
 0x38f   : > { %v830_v14 = vsel %vm828_vm3, %v823_v9, %v829_v12 }
 0x390   : > { %v831_v15 = vadd.f32 %v830_v14, %v722_v3 }
 0x392   : > { %v832_v16 = vpack.c.bf16 %v831_v15, %v831_v15 }
 0x394   : > { %1289 = vmatmul.mubr.bf16.vlgmr.msra.gmra.mrb[4].mxu1 %v832_v16 }
 0x467   : > { %v931_v17 = vpop.f32.mrb[4].mxu1 }
 0x468   : > { %v932_v18 = vadd.f32 %v931_v17, %v460_v1  ;;  %v1290_v19 = vpop.f32.mrb[5].mxu1 }
 0x469   : > { %v934_v20 = vpop.f32.mrb[6].mxu1 }
 0x46a   : > { %937 = vst [vmem:[%s455_s1] sm:$0xff] %v932_v18  ;;  %v1291_v21 = vpop.f32.mrb[7].mxu1 }
 0x46b   : > { %1634 = shalt.err (!%p1631_p11)
}
 0x46c   : > { %s1635_s23 = scalar_lea.hbm %s2176_s7, 128  ;;  %s1639_s6 = scalar_lea.hbm %s2288_s12, 256 }
 0x46d   : > { %p1636_p2 = scmp.ne.s32.totalorder %s2176_s7, %s1635_s23  ;;  %p1640_p5 = scmp.lt.u32.totalorder %s2176_s7, %s2288_s12 }
 0x46e   : > { %p1641_p13 = scmp.lt.u32.totalorder %s1639_s6, %s1635_s23  ;;  %p1643_p6 = scmp.lt.u32.totalorder %s1635_s23, %s2176_s7 }
 0x46f   : > { %p1637_p8 = pnand %p1636_p2, %p2289_p12 }
 0x470   : > { %p1642_p7 = por %p1641_p13, %p1640_p5 }
 0x471   : > { %p1638_p10 = pneg %p1637_p8 }
 0x472   : > { %p1644_p3 = por %p1643_p6, %p1642_p7 }
 0x474   : > { %p1645_p4 = pnand %p1644_p3, %p1638_p10 }
 0x476   : > { %1648 = shalt.err (!%p1645_p4)
}
 0x477   : > { %1309 = dma.vmem_to_hbm [thread:$0]  (%p2289_p12), %s2178_s13, 128, %s2176_s7, %s939_s3  }
 0x478 PF: > { %s2290_s2 = sld [smem:[#allocation19_spill]]  ;;  %s2291_s17 = sld [smem:[#allocation25_spill]] }
 0x479   : > { %s2292_s11 = sld [smem:[#allocation21_spill]] }
 0x47e   : > { %s965_s18 = sand.u32 1, %s2290_s2   ;;  %p2293_p1 = scmp.ne.s32.totalorder %s2291_s17, 0 }
 0x47f   : > { %p2294_p9 = scmp.ge.s32.totalorder %s2292_s11, 2  ;;  %s966_s8 = scalar_lea.sflag [#allocation4], %s965_s18 }
 0x481   : > { %p1332_p0 = pnand %p2294_p9, %p2293_p1 }
 0x483   : > { %1690 = dma.done.wait (!%p1332_p0), %s966_s8, 128  }
 0x484   : > { %1692 = vsyncadd (!%p1332_p0), %s966_s8, 4294967168  ;;  %s29_s26 = sadd.s32 1, %s2292_s11   ;;  %s2295_s15 = sld [smem:[#allocation20_spill]] }
 0x485   : > { %p26_p11 = scmp.ge.s32.totalorder %s29_s26, 4   ;;  %s2296_s23 = sld [smem:[#allocation23_spill]] }
 0x486   : > { %s2297_s30 = sld [smem:[#allocation22_spill]]  ;;  %s2298_s21 = smov %s1699_s22 }
 0x487   : > { %s2300_s24 = smov %s1711_s25  ;;  %28 = sbr.rel (!%p26_p11) target bundleno = 16 (0x10), region = 143 }
 0x48a   : > { %s2299_s22 = smov %s2295_s15 }
 0x48c   : > { %s2301_s25 = smov %s2297_s30 }
 0x48e   :  { %971 = vsyncpa [#allocation3], 1 }
 0x48f   :  { %973 = vsyncpa [#allocation3 + $0x1], 1 }
 0x490   :  { %974 = vsyncpa [#allocation6], 1 }
 0x491   :  { %976 = vsyncpa [#allocation6 + $0x1], 1 }
 0x492   :  { %977 = vsyncpa [#allocation9], 1 }
 0x493   :  { %979 = vsyncpa [#allocation9 + $0x1], 1 }
 0x494   :  { %980 = vsyncpa [#allocation12], 1 }
 0x495   :  { %982 = vsyncpa [#allocation12 + $0x1], 1 }
 0x496   :  { %983 = vsyncpa [#allocation4], 1 }
 0x497   :  { %985 = vsyncpa [#allocation4 + $0x1], 1 }

</bundles_post_ra>
